<compile_context>
chip_gen: v6e
topology: v6e:2x2x1
jax: 0.10.0
libtpu: 0.0.40
codegen_flags: <defaults>
</compile_context>

<pallas_src>
import functools

import jax
import jax.numpy as jnp
from jax import lax
from jax.experimental import pallas as pl
from jax.experimental.pallas import tpu as pltpu


def _dice_partial_kernel(x_ref, t_ref, inter_ref, union_ref, *,
                         hw, tile, tiles_per_split, num_tiles, ragged):
    """One (batch n, pixel-split p, pixel-tile j) grid step.

    x_ref:  (C, tile)  logits tile (original dtype, cast to f32 in-register)
    t_ref:  (1, tile)  int32 labels
    inter_ref / union_ref: (C, 1) f32 partials, resident across the inner
    (pixel-tile, "arbitrary") grid axis; one block per (n, p).
    """
    p_id = pl.program_id(1)
    j = pl.program_id(2)
    g = p_id * tiles_per_split + j          # global pixel-tile index

    @pl.when(j == 0)
    def _():
        inter_ref[...] = jnp.zeros_like(inter_ref)
        union_ref[...] = jnp.zeros_like(union_ref)

    def accumulate(x, t, recip_scale):
        # Numerically-stable softmax over the class (sublane) axis.
        mx = jnp.max(x, axis=0, keepdims=True)
        e = jnp.exp(x - mx)
        denom = jnp.sum(e, axis=0, keepdims=True)
        r = pl.reciprocal(denom, approx=False)       # EUP slot, not a VPU divide
        if recip_scale is not None:
            r = r * recip_scale                      # zeroes out invalid lanes
        prob = e * r                                 # (C, tile)

        cls = lax.broadcasted_iota(jnp.int32, prob.shape, 0)
        eq = cls == t                                # in-register one-hot mask
        inter_ref[...] += jnp.sum(jnp.where(eq, prob, 0.0),
                                  axis=1, keepdims=True)          # (C, 1)
        union_ref[...] += jnp.sum(jnp.where(eq, prob + 1.0, prob),
                                  axis=1, keepdims=True)          # (C, 1)

    if ragged:
        last = num_tiles - 1

        @pl.when(g < last)
        def _():  # full interior tiles: zero masking cost
            accumulate(x_ref[...].astype(jnp.float32), t_ref[...], None)

        @pl.when(g >= last)
        def _():  # final (possibly partial) tile and any overflow tiles
            lane = lax.broadcasted_iota(jnp.int32, (1, tile), 1)
            valid = (g * tile + lane) < hw           # (1, tile) bool
            # Sanitize BEFORE exp: OOB lanes may hold arbitrary garbage.
            x = jnp.where(valid, x_ref[...].astype(jnp.float32), 0.0)
            t = jnp.where(valid, t_ref[...], jnp.int32(-1))   # out-of-range label
            accumulate(x, t, valid.astype(jnp.float32))
    else:
        accumulate(x_ref[...].astype(jnp.float32), t_ref[...], None)


def dice_loss(logits, targets, smooth=1e-6, *,
              tile_lanes=None, pixel_splits=None,
              target_bytes_per_step=2 << 20, max_tile=128 * 1024):
    """logits: (N, C, H, W) float; targets: (N, H, W) int labels in [0, C)."""
    N, C, H, W = logits.shape
    HW = H * W

    # Free layout views: no HBM transpose, no wrapper dtype widening, no pad.
    x = logits.reshape(N, C, HW)
    t = targets.reshape(N, 1, HW).astype(jnp.int32)

    itemsize = jnp.dtype(x.dtype).itemsize
    per_lane = C * itemsize + 4                  # logits + int32 label per pixel

    if tile_lanes is None:
        # Size the tile so each grid step streams ~target_bytes_per_step.
        tile = (target_bytes_per_step // per_lane) // 128 * 128
        tile = int(max(512, min(max_tile, tile)))
    else:
        tile = max(128, (int(tile_lanes) // 128) * 128)
    tile = min(tile, pl.cdiv(HW, 128) * 128)     # don't exceed (rounded-up) HW

    num_tiles = pl.cdiv(HW, tile)

    if pixel_splits is None:
        # Keep both v7x TensorCores busy even when N == 1.
        pixel_splits = 2 if (N == 1 and num_tiles >= 2) else 1
    P = max(1, min(int(pixel_splits), num_tiles))
    tps = pl.cdiv(num_tiles, P)                  # pixel tiles per split

    # Masking only needed on the last real tile (ragged HW) or on overflow
    # tiles introduced by an uneven split.
    ragged = (num_tiles * tile != HW) or (P * tps != num_tiles)
    last_blk = num_tiles - 1

    def in_map(n, p, j):
        # Clamp so overflow tiles of an uneven split re-read the last block
        # (their contribution is fully masked off inside the kernel).
        return (n, 0, jnp.minimum(p * tps + j, last_blk))

    kernel = functools.partial(
        _dice_partial_kernel, hw=HW, tile=tile, tiles_per_split=tps,
        num_tiles=num_tiles, ragged=ragged)

    # Double-buffered inputs + tiny outputs; safe on v5e/v6e (128 MiB VMEM)
    # and v7x (64 MiB physical, 32 MiB scoped default).
    vmem_limit = int(min(30 << 20,
                         max(16 << 20, 2 * per_lane * tile + (2 << 20))))

    inter_p, union_p = pl.pallas_call(
        kernel,
        out_shape=(jax.ShapeDtypeStruct((N, P, C, 1), jnp.float32),
                   jax.ShapeDtypeStruct((N, P, C, 1), jnp.float32)),
        grid_spec=pltpu.PrefetchScalarGridSpec(
            num_scalar_prefetch=0,
            grid=(N, P, tps),
            in_specs=[
                pl.BlockSpec((None, C, tile), in_map),
                pl.BlockSpec((None, 1, tile), in_map),
            ],
            out_specs=(
                pl.BlockSpec((None, None, C, 1), lambda n, p, j: (n, p, 0, 0)),
                pl.BlockSpec((None, None, C, 1), lambda n, p, j: (n, p, 0, 0)),
            ),
        ),
        compiler_params=pltpu.CompilerParams(
            dimension_semantics=("parallel", "parallel", "arbitrary"),
            vmem_limit_bytes=vmem_limit),
    )(x, t)

    # Tiny final combine in plain JAX (matches reduction dims (0, 2, 3)).
    inter = jnp.sum(inter_p, axis=(0, 1, 3))     # (C,)
    union = jnp.sum(union_p, axis=(0, 1, 3))     # (C,)
    dice = (2.0 * inter + smooth) / (union + smooth)
    return 1.0 - jnp.mean(dice)


def _dice_loss_ref(logits, targets, smooth=1e-6):
    """Pure-JAX reference matching the PyTorch module."""
    probs = jax.nn.softmax(logits, axis=1)
    num_classes = logits.shape[1]
    oh = jax.nn.one_hot(targets, num_classes, dtype=jnp.float32)   # (N,H,W,C)
    oh = jnp.transpose(oh, (0, 3, 1, 2))                           # (N,C,H,W)
    dims = (0, 2, 3)
    intersection = jnp.sum(probs * oh, axis=dims)
    union = jnp.sum(probs, axis=dims) + jnp.sum(oh, axis=dims)
    dice = (2.0 * intersection + smooth) / (union + smooth)
    return 1.0 - jnp.mean(dice)


if __name__ == "__main__":
    key = jax.random.PRNGKey(0)
    k1, k2, k3, k4, k5, k6 = jax.random.split(key, 6)

    # Primary small case (module-consistent shapes).
    N, C, H, W = 2, 4, 16, 16
    logits = jax.random.normal(k1, (N, C, H, W), dtype=jnp.float32)
    targets = jax.random.randint(k2, (N, H, W), 0, C, dtype=jnp.int32)
    out = jax.block_until_ready(dice_loss(logits, targets))
    ref = jax.block_until_ready(_dice_loss_ref(logits, targets))
    assert jnp.allclose(out, ref, atol=1e-5, rtol=1e-5), (out, ref)

    # Ragged HW + dual pixel-split (dual-TC path on v7x), N == 1.
    logits2 = jax.random.normal(k3, (1, 3, 17, 29), dtype=jnp.float32)
    targets2 = jax.random.randint(k4, (1, 17, 29), 0, 3, dtype=jnp.int32)
    out2 = jax.block_until_ready(dice_loss(logits2, targets2, tile_lanes=256))
    ref2 = jax.block_until_ready(_dice_loss_ref(logits2, targets2))
    assert jnp.allclose(out2, ref2, atol=1e-5, rtol=1e-5), (out2, ref2)

    # Multi-tile accumulation along the 'arbitrary' axis + ragged last tile.
    logits3 = jax.random.normal(k5, (2, 5, 20, 23), dtype=jnp.float32)
    targets3 = jax.random.randint(k6, (2, 20, 23), 0, 5, dtype=jnp.int32)
    out3 = jax.block_until_ready(dice_loss(logits3, targets3, tile_lanes=128))
    ref3 = jax.block_until_ready(_dice_loss_ref(logits3, targets3))
    assert jnp.allclose(out3, ref3, atol=1e-5, rtol=1e-5), (out3, ref3)

    print("KERNEL_OK")
</pallas_src>

<mosaic_0001>
module attributes {stable_mosaic.version = 11 : i64} {
  func.func @_dice_partial_kernel(%arg0: i32, %arg1: i32, %arg2: i32, %arg3: memref<1x4x256xf32, #tpu.memory_space<vmem>>, %arg4: memref<1x1x256xi32, #tpu.memory_space<vmem>>, %arg5: memref<1x1x4x1xf32, #tpu.memory_space<vmem>>, %arg6: memref<1x1x4x1xf32, #tpu.memory_space<vmem>>) attributes {dimension_semantics = [#tpu.dimension_semantics<parallel>, #tpu.dimension_semantics<parallel>, #tpu.dimension_semantics<arbitrary>], iteration_bounds = array<i64: 2, 1, 1>, scalar_prefetch = 0 : i64, scratch_operands = 0 : i64, tpu.core_type = #tpu.core_type<tc>, window_params = [{transform_indices = @transform_0, window_bounds = array<i64: 1, 4, 256>}, {transform_indices = @transform_1, window_bounds = array<i64: 1, 1, 256>}, {transform_indices = @transform_2, window_bounds = array<i64: 1, 1, 4, 1>}, {transform_indices = @transform_3, window_bounds = array<i64: 1, 1, 4, 1>}]} {
    %c0_i32 = arith.constant 0 : i32
    %0 = arith.cmpi eq, %arg2, %c0_i32 : i32
    %1 = arith.extui %0 : i1 to i32
    %c0_i32_0 = arith.constant 0 : i32
    %2 = arith.cmpi ne, %1, %c0_i32_0 : i32
    scf.if %2 {
      %cst_27 = arith.constant 0.000000e+00 : f32
      %41 = vector.broadcast %cst_27 : f32 to vector<4x1xf32>
      %c0_28 = arith.constant 0 : index
      %c0_29 = arith.constant 0 : index
      %c0_30 = arith.constant 0 : index
      %c0_31 = arith.constant 0 : index
      %42 = vector.load %arg5[%c0_28, %c0_29, %c0_30, %c0_31] : memref<1x1x4x1xf32, #tpu.memory_space<vmem>>, vector<1x1x4x1xf32>
      %43 = vector.shape_cast %42 : vector<1x1x4x1xf32> to vector<4x1xf32>
      %44 = vector.shape_cast %41 : vector<4x1xf32> to vector<1x1x4x1xf32>
      tpu.vector_store %arg5[%c0_28, %c0_29, %c0_30, %c0_31], %44 {strides = array<i32>} : memref<1x1x4x1xf32, #tpu.memory_space<vmem>>, vector<1x1x4x1xf32>,
      %cst_32 = arith.constant 0.000000e+00 : f32
      %45 = vector.broadcast %cst_32 : f32 to vector<4x1xf32>
      %c0_33 = arith.constant 0 : index
      %c0_34 = arith.constant 0 : index
      %c0_35 = arith.constant 0 : index
      %c0_36 = arith.constant 0 : index
      %46 = vector.load %arg6[%c0_33, %c0_34, %c0_35, %c0_36] : memref<1x1x4x1xf32, #tpu.memory_space<vmem>>, vector<1x1x4x1xf32>
      %47 = vector.shape_cast %46 : vector<1x1x4x1xf32> to vector<4x1xf32>
      %48 = vector.shape_cast %45 : vector<4x1xf32> to vector<1x1x4x1xf32>
      tpu.vector_store %arg6[%c0_33, %c0_34, %c0_35, %c0_36], %48 {strides = array<i32>} : memref<1x1x4x1xf32, #tpu.memory_space<vmem>>, vector<1x1x4x1xf32>,
    } else {
    }
    %c0 = arith.constant 0 : index
    %c0_1 = arith.constant 0 : index
    %c0_2 = arith.constant 0 : index
    %3 = vector.load %arg3[%c0, %c0_1, %c0_2] : memref<1x4x256xf32, #tpu.memory_space<vmem>>, vector<1x4x256xf32>
    %4 = vector.shape_cast %3 : vector<1x4x256xf32> to vector<4x256xf32>
    %c0_3 = arith.constant 0 : index
    %c0_4 = arith.constant 0 : index
    %c0_5 = arith.constant 0 : index
    %5 = vector.load %arg4[%c0_3, %c0_4, %c0_5] : memref<1x1x256xi32, #tpu.memory_space<vmem>>, vector<1x1x256xi32>
    %6 = vector.shape_cast %5 : vector<1x1x256xi32> to vector<1x256xi32>
    %cst = arith.constant dense<0xFF800000> : vector<256xf32>
    %7 = vector.multi_reduction <maximumf>, %4, %cst [0] : vector<4x256xf32> to vector<256xf32>
    %8 = vector.shape_cast %7 : vector<256xf32> to vector<1x256xf32>
    %9 = vector.broadcast %8 : vector<1x256xf32> to vector<4x256xf32>
    %10 = arith.subf %4, %9 : vector<4x256xf32>
    %11 = math.exp %10 : vector<4x256xf32>
    %cst_6 = arith.constant dense<0.000000e+00> : vector<256xf32>
    %12 = vector.multi_reduction <add>, %11, %cst_6 [0] : vector<4x256xf32> to vector<256xf32>
    %13 = vector.shape_cast %12 : vector<256xf32> to vector<1x256xf32>
    %14 = tpu.reciprocal %13 : vector<1x256xf32> -> vector<1x256xf32>
    %15 = vector.broadcast %14 : vector<1x256xf32> to vector<4x256xf32>
    %16 = arith.mulf %11, %15 : vector<4x256xf32>
    %17 = tpu.iota {dimensions = array<i32: 0>} : vector<4x256xi32>
    %18 = vector.broadcast %6 : vector<1x256xi32> to vector<4x256xi32>
    %19 = arith.cmpi eq, %17, %18 : vector<4x256xi32>
    %c0_7 = arith.constant 0 : index
    %c0_8 = arith.constant 0 : index
    %c0_9 = arith.constant 0 : index
    %c0_10 = arith.constant 0 : index
    %20 = vector.load %arg5[%c0_7, %c0_8, %c0_9, %c0_10] : memref<1x1x4x1xf32, #tpu.memory_space<vmem>>, vector<1x1x4x1xf32>
    %21 = vector.shape_cast %20 : vector<1x1x4x1xf32> to vector<4x1xf32>
    %cst_11 = arith.constant 0.000000e+00 : f32
    %22 = vector.broadcast %cst_11 : f32 to vector<4x256xf32>
    %23 = arith.select %19, %16, %22 : vector<4x256xi1>, vector<4x256xf32>
    %cst_12 = arith.constant dense<0.000000e+00> : vector<4xf32>
    %24 = vector.multi_reduction <add>, %23, %cst_12 [1] : vector<4x256xf32> to vector<4xf32>
    %25 = vector.shape_cast %24 : vector<4xf32> to vector<4x1xf32>
    %26 = arith.addf %21, %25 : vector<4x1xf32>
    %c0_13 = arith.constant 0 : index
    %c0_14 = arith.constant 0 : index
    %c0_15 = arith.constant 0 : index
    %c0_16 = arith.constant 0 : index
    %27 = vector.load %arg5[%c0_13, %c0_14, %c0_15, %c0_16] : memref<1x1x4x1xf32, #tpu.memory_space<vmem>>, vector<1x1x4x1xf32>
    %28 = vector.shape_cast %27 : vector<1x1x4x1xf32> to vector<4x1xf32>
    %29 = vector.shape_cast %26 : vector<4x1xf32> to vector<1x1x4x1xf32>
    tpu.vector_store %arg5[%c0_13, %c0_14, %c0_15, %c0_16], %29 {strides = array<i32>} : memref<1x1x4x1xf32, #tpu.memory_space<vmem>>, vector<1x1x4x1xf32>,
    %c0_17 = arith.constant 0 : index
    %c0_18 = arith.constant 0 : index
    %c0_19 = arith.constant 0 : index
    %c0_20 = arith.constant 0 : index
    %30 = vector.load %arg6[%c0_17, %c0_18, %c0_19, %c0_20] : memref<1x1x4x1xf32, #tpu.memory_space<vmem>>, vector<1x1x4x1xf32>
    %31 = vector.shape_cast %30 : vector<1x1x4x1xf32> to vector<4x1xf32>
    %cst_21 = arith.constant 1.000000e+00 : f32
    %32 = vector.broadcast %cst_21 : f32 to vector<4x256xf32>
    %33 = arith.addf %16, %32 : vector<4x256xf32>
    %34 = arith.select %19, %33, %16 : vector<4x256xi1>, vector<4x256xf32>
    %cst_22 = arith.constant dense<0.000000e+00> : vector<4xf32>
    %35 = vector.multi_reduction <add>, %34, %cst_22 [1] : vector<4x256xf32> to vector<4xf32>
    %36 = vector.shape_cast %35 : vector<4xf32> to vector<4x1xf32>
    %37 = arith.addf %31, %36 : vector<4x1xf32>
    %c0_23 = arith.constant 0 : index
    %c0_24 = arith.constant 0 : index
    %c0_25 = arith.constant 0 : index
    %c0_26 = arith.constant 0 : index
    %38 = vector.load %arg6[%c0_23, %c0_24, %c0_25, %c0_26] : memref<1x1x4x1xf32, #tpu.memory_space<vmem>>, vector<1x1x4x1xf32>
    %39 = vector.shape_cast %38 : vector<1x1x4x1xf32> to vector<4x1xf32>
    %40 = vector.shape_cast %37 : vector<4x1xf32> to vector<1x1x4x1xf32>
    tpu.vector_store %arg6[%c0_23, %c0_24, %c0_25, %c0_26], %40 {strides = array<i32>} : memref<1x1x4x1xf32, #tpu.memory_space<vmem>>, vector<1x1x4x1xf32>,
    return
  }
  func.func @transform_0(%arg0: i32, %arg1: i32, %arg2: i32) -> (i32, i32, i32) {
    %c1_i32 = arith.constant 1 : i32
    %0 = arith.muli %arg1, %c1_i32 : i32
    %1 = arith.addi %0, %arg2 : i32
    %c0_i32 = arith.constant 0 : i32
    %2 = arith.minsi %1, %c0_i32 : i32
    %c0_i32_0 = arith.constant 0 : i32
    %c0_i32_1 = arith.constant 0 : i32
    return %arg0, %c0_i32_0, %2 : i32, i32, i32
  }
  func.func @transform_1(%arg0: i32, %arg1: i32, %arg2: i32) -> (i32, i32, i32) {
    %c1_i32 = arith.constant 1 : i32
    %0 = arith.muli %arg1, %c1_i32 : i32
    %1 = arith.addi %0, %arg2 : i32
    %c0_i32 = arith.constant 0 : i32
    %2 = arith.minsi %1, %c0_i32 : i32
    %c0_i32_0 = arith.constant 0 : i32
    %c0_i32_1 = arith.constant 0 : i32
    return %arg0, %c0_i32_0, %2 : i32, i32, i32
  }
  func.func @transform_2(%arg0: i32, %arg1: i32, %arg2: i32) -> (i32, i32, i32, i32) {
    %c0_i32 = arith.constant 0 : i32
    %c0_i32_0 = arith.constant 0 : i32
    %c0_i32_1 = arith.constant 0 : i32
    return %arg0, %arg1, %c0_i32, %c0_i32_0 : i32, i32, i32, i32
  }
  func.func @transform_3(%arg0: i32, %arg1: i32, %arg2: i32) -> (i32, i32, i32, i32) {
    %c0_i32 = arith.constant 0 : i32
    %c0_i32_0 = arith.constant 0 : i32
    %c0_i32_1 = arith.constant 0 : i32
    return %arg0, %arg1, %c0_i32, %c0_i32_0 : i32, i32, i32, i32
  }
}

</mosaic_0001>

<bundles_post_ra>
// kernel: tpu_custom_call.1
= control target key start
LH: loop header
LB: loop body
LE: loop exit
PB: predicated region body
PF: predicated region fallthrough
CT: control target
= control target key end

     0   :  { %9 = vsyncpa [#allocation3], 0  ;;  %s941_s0 = inlined_call_operand.hbm [shape: f32[2,4,256], index: 0, kind: input, shape index: {}]   ;;  %s942_s1 = inlined_call_operand.hbm [shape: s32[2,1,256], index: 1, kind: input, shape index: {}]   ;;  %s943_s2 = inlined_call_operand.vmem [shape: f32[2,1,4,1], index: 2, kind: output, shape index: {0}]   ;;  %s944_s3 = inlined_call_operand.vmem [shape: f32[2,1,4,1], index: 3, kind: output, shape index: {1}]  }
   0x1   :  { %11 = vsyncpa [#allocation3 + $0x1], 0 }
   0x2   :  { %12 = vsyncpa [#allocation5], 0 }
   0x3   :  { %14 = vsyncpa [#allocation5 + $0x1], 0  ;;  %s781_s12 = smov 0   ;;  %s783_s13 = smov 0  }
   0x4   :  { %s785_s14 = smov 0   ;;  %s787_s15 = smov 0  }
   0x5   :  { %s789_s16 = smov 0   ;;  %s791_s17 = smov 0  }
   0x6 LB: > { %s559_s18 = sadd.s32 4294967295, %s756_s17   ;;  %s39_s19 = sadd.s32 1, %s752_s16  ;;  %s756_s17 = sphi %s791_s17, %s20_s17   ;;  %s752_s16 = sphi %s789_s16, %s953_s16   ;;  %s748_s15 = sphi %s787_s15, %s952_s15   ;;  %s744_s14 = sphi %s785_s14, %s951_s14   ;;  %s740_s13 = sphi %s783_s13, %s950_s13   ;;  %s736_s12 = sphi %s781_s12, %s949_s12  }
   0x7   : > { %p41_p0 = scmp.ge.s32.totalorder %s39_s19, 2  ;;  %s54_s20 = sadd.s32 1, %s744_s14 }
   0x8   : > { %p61_p1 = scmp.ne.s32.totalorder %s744_s14, %s740_s13  ;;  %p62_p2 = scmp.eq.s32.totalorder %s756_s17, 0 }
   0x9   : > { %s955_s19 = smov (%p41_p0, %s39_s19), 0  ;;  %p67_p4 = scmp.ne.s32.totalorder %s740_s13, %s736_s12 }
   0xa   : > { %p817_p3 = por %p62_p2, %p61_p1  ;;  %s49_s22 = ssub.s32 %s752_s16, %s955_s19 }
   0xb   : > { %p68_p5 = scmp.eq.s32.totalorder %s559_s18, 0  ;;  %p52_p6 = scmp.eq.s32.totalorder %s49_s22, 0 }
   0xc   : > { %p589_p8 = scmp.lt.s32.totalorder %s756_s17, 2  ;;  %s833_s25 = sand.u32 1, %s744_s14  }
   0xd   : > { %p824_p7 = por %p68_p5, %p67_p4  ;;  %s576_s26 = sshll.u32 %s752_s16, 7 }
   0xe   : > { %s830_s24 = scalar_select %p52_p6, %s744_s14, %s54_s20  }
   0xf   : > { %s563_s27 = sshll.u32 %s833_s25, 3  ;;  %s196_s30 = scalar_lea.hbm %s941_s0, %s576_s26 }
  0x10   : > { %s185_s4 = scalar_lea.vmem [#allocation2], %s563_s27  ;;  %p842_p9 = pnand %p589_p8, %p817_p3 }
  0x11   : > { %s198_s5 = sshll.u32 %s185_s4, 4  ;;  %p569_p10 = scmp.ge.s32.totalorder %s756_s17, 1  ;;  %s199_s5 = int_to_ptr.vmem [resolvable:$true] %s198_s5 }
  0x12   : > { %p227_p11 = scmp.lt.s32.totalorder %s756_s17, 3  ;;  %s182_s7 = scalar_lea.sflag [#allocation3], %s833_s25 }
  0x13   : > { %p648_p12 = pneg %p842_p9  ;;  %s659_s8 = scalar_lea.vmem %s199_s5, 128 }
  0x14   : > { %p660_p13 = scmp.ne.s32.totalorder %s199_s5, %s659_s8  ;;  %s758_s9 = smov [#allocation2]  }
  0x15   : > { %s664_s10 = sshll.u32 %s758_s9, 4  ;;  %s665_s10 = int_to_ptr.vmem [resolvable:$false] %s664_s10 }
  0x16   : > { %p662_p0 = pnand %p660_p13, %p648_p12  ;;  %s666_s11 = scalar_lea.vmem %s665_s10, 256 }
  0x17   : > { %p667_p2 = scmp.lt.s32.totalorder %s199_s5, %s665_s10  ;;  %p668_p3 = scmp.lt.s32.totalorder %s666_s11, %s659_s8 }
  0x18   : > { %p663_p1 = pneg %p662_p0 }
  0x19   : > { %p669_p4 = por %p668_p3, %p667_p2 }
  0x1b   : > { %p670_p5 = pnand %p669_p4, %p663_p1 }
  0x1d   : > { %673 = shalt.err (!%p670_p5)
}
  0x1e   : > { %585 = dma.hbm_to_vmem [thread:$0]  (!%p842_p9), %s196_s30, 128, %s199_s5, %s182_s7  }
  0x1f   : > { %p860_p6 = pnand %p569_p10, %p227_p11  ;;  %s566_s18 = sshll.u32 %s833_s25, 1 }
  0x20   : > { %s577_s20 = sshll.u32 %s752_s16, 5  ;;  %s209_s27 = scalar_lea.vmem [#allocation4], %s566_s18 }
  0x21   : > { %s220_s26 = scalar_lea.hbm %s942_s1, %s577_s20  ;;  %s222_s28 = sshll.u32 %s209_s27, 4  ;;  %s223_s28 = int_to_ptr.vmem [resolvable:$true] %s222_s28 }
  0x22   : > { %s206_s29 = scalar_lea.sflag [#allocation5], %s833_s25  ;;  %s687_s4 = scalar_lea.vmem %s223_s28, 32 }
  0x23   : > { %p688_p8 = scmp.ne.s32.totalorder %s223_s28, %s687_s4  ;;  %s759_s30 = smov [#allocation4]  }
  0x24   : > { %s692_s5 = sshll.u32 %s759_s30, 4  ;;  %s693_s5 = int_to_ptr.vmem [resolvable:$false] %s692_s5 }
  0x25   : > { %p690_p13 = pnand %p688_p8, %p648_p12  ;;  %s694_s7 = scalar_lea.vmem %s693_s5, 64 }
  0x26   : > { %p695_p10 = scmp.lt.s32.totalorder %s223_s28, %s693_s5  ;;  %p696_p11 = scmp.lt.s32.totalorder %s694_s7, %s687_s4 }
  0x27   : > { %p691_p0 = pneg %p690_p13 }
  0x28   : > { %p697_p1 = por %p696_p11, %p695_p10 }
  0x2a   : > { %p698_p2 = pnand %p697_p1, %p691_p0 }
  0x2c   : > { %701 = shalt.err (!%p698_p2)
}
  0x2d   : > { %588 = dma.hbm_to_vmem [thread:$0]  (!%p842_p9), %s220_s26, 32, %s223_s28, %s206_s29  }
  0x2e   : > { %231 = sbr.rel (%p860_p6) target bundleno = 275 (0x113), region = 28  ;;  %s233_s25 = sand.u32 (!%p860_p6), 1, %s740_s13  }
  0x2f   : > { %s570_s8 = sshll.u32 (!%p860_p6), %s233_s25, 3  ;;  %s234_s9 = scalar_lea.sflag (!%p860_p6), [#allocation3], %s233_s25 }
  0x30   : > { %s237_s10 = scalar_lea.vmem (!%p860_p6), [#allocation2], %s570_s8 }
  0x33   : > { %727 = dma.done.wait (%p824_p7), %s234_s9, 128  }
  0x34   : > { %729 = vsyncadd (%p824_p7), %s234_s9, 4294967168  ;;  %s571_s11 = sshll.u32 %s233_s25, 1  ;;  %s243_s18 = scalar_lea.sflag [#allocation5], %s233_s25 }
  0x35   : > { %s882_s20 = scalar_lea.vmem [#allocation4], %s571_s11 }
  0x36   : > { %731 = dma.done.wait (%p824_p7), %s243_s18, 32  }
  0x37   : > { %733 = vsyncadd (%p824_p7), %s243_s18, 4294967264  ;;  %p291_p9 = scmp.lt.s32.totalorder %s748_s15, 1  ;;  %vm309_vm0 = vcmask 3072   ;;  %vm317_vm1 = vcmask 1043456   ;;  %v760_v0 = vmov 0.0   ;;  %v312_v1 = vld [vmem:[%s237_s10] sm:$0xff]  ;;  %v363_v36 = vlaneseq }
  0x38   : > { %v315_v2 = vcombine.high %v312_v1, %v312_v1  ;;  %v318_v3 = vsel %vm317_vm1, %v312_v1, -inf  ;;  %v313_v39 = vld [vmem:[%s882_s20] sm:$0x3] }
  0x39   : > { %s957_s15 = smov (!%p291_p9, %s748_s15), 1  ;;  %v319_v4 = vrot.slane %v318_v3, 4  ;;  %v364_v37 = vshrl.u32 %v363_v36, 7 }
  0x3a   : > { %s572_s6 = sshll.u32 %s957_s15, 2  ;;  %v325_v5 = vsel %vm317_vm1, %v315_v2, -inf }
  0x3b   : > { %s898_s22 = scalar_lea.vmem %s943_s2, %s572_s6  ;;  %v320_v6 = vmax.f32 %v318_v3, %v319_v4  ;;  %v326_v7 = vrot.slane %v325_v5, 4  ;;  %v367_v38 = vsub.s32 0, %v364_v37  ;;  %v371_v40 = vsub.s32 1, %v364_v37  ;;  %s304_s27 = scalar_lea.vmem %s944_s3, %s572_s6 }
  0x3c   : > { %310 = vst.msk [vmem:[%s898_s22] sm:$0xf] %vm309_vm0, %v760_v0  ;;  %311 = vst.msk [vmem:[%s304_s27] sm:$0xf] %vm309_vm0, %v760_v0 }
  0x3d   : > { %v321_v8 = vrot.slane %v320_v6, 2  ;;  %v327_v9 = vmax.f32 %v325_v5, %v326_v7  ;;  %v368_v42 = vrot.slane %v313_v39, %v367_v38  ;;  %v372_v44 = vrot.slane %v313_v39, %v371_v40 }
  0x3f   : > { %v322_v10 = vmax.f32 %v320_v6, %v321_v8  ;;  %v328_v11 = vrot.slane %v327_v9, 2  ;;  %vm373_vm2 = vcmp.eq.s32.totalorder %v364_v37, %v368_v42  ;;  %vm374_vm3 = vcmp.eq.s32.totalorder %v364_v37, %v372_v44 }
  0x41   : > { %v323_v12 = vrot.slane %v322_v10, 1  ;;  %v329_v13 = vmax.f32 %v327_v9, %v328_v11 }
  0x43   : > { %v324_v14 = vmax.f32 %v322_v10, %v323_v12  ;;  %v330_v15 = vrot.slane %v329_v13, 1  ;;  %v375_v60 = vld [vmem:[%s898_s22] sm:$0xf] }
  0x44   : > { %v389_v63 = vld [vmem:[%s304_s27] sm:$0xf] }
  0x45   : > { %v331_v16 = vmax.f32 %v329_v13, %v330_v15 }
  0x47   : > { %v334_v17 = vcombine.low %v324_v14, %v331_v16 }
  0x49   : > { %v336_v18 = vsub.f32 %v312_v1, %v334_v17 }
  0x4b   : > { %v337_v19 = vmul.f32 1.442695, %v336_v18 }
  0x4d   : > { %640 = vpow2.f32 %v337_v19 }
  0x5a   : > { %v641_v20 = vpop.eup %640 }
  0x5b   : > { %v340_v21 = vcombine.high %v641_v20, %v641_v20  ;;  %v342_v22 = vsel %vm317_vm1, %v641_v20, 0.0 }
  0x5c   : > { %v343_v23 = vrot.slane %v342_v22, 4 }
  0x5d   : > { %v349_v24 = vsel %vm317_vm1, %v340_v21, 0.0 }
  0x5e   : > { %v344_v25 = vadd.f32 %v343_v23, %v342_v22  ;;  %v350_v26 = vrot.slane %v349_v24, 4 }
  0x60   : > { %v345_v27 = vrot.slane %v344_v25, 2  ;;  %v351_v28 = vadd.f32 %v350_v26, %v349_v24 }
  0x62   : > { %v346_v29 = vadd.f32 %v345_v27, %v344_v25  ;;  %v352_v30 = vrot.slane %v351_v28, 2 }
  0x64   : > { %v347_v31 = vrot.slane %v346_v29, 1  ;;  %v353_v32 = vadd.f32 %v352_v30, %v351_v28 }
  0x66   : > { %v348_v33 = vadd.f32 %v347_v31, %v346_v29  ;;  %v354_v34 = vrot.slane %v353_v32, 1 }
  0x68   : > { %v355_v35 = vadd.f32 %v354_v34, %v353_v32  ;;  %642 = vrcp.f32 %v348_v33 }
  0x6a   : > { %644 = vrcp.f32 %v355_v35 }
  0x75   : > { %v643_v41 = vpop.eup %642 }
  0x77   : > { %v645_v43 = vpop.eup %644 }
  0x78   : > { %v360_v45 = vcombine.low %v643_v41, %v645_v43 }
  0x7a   : > { %v362_v46 = vmul.f32 %v641_v20, %v360_v45 }
  0x7c   : > { %v377_v47 = vcombine.high %v362_v46, %v362_v46  ;;  %v379_v48 = vsel %vm373_vm2, %v362_v46, 0.0  ;;  %v390_v49 = vadd.f32 1.0, %v362_v46 }
  0x7d   : > { %v381_v50 = vsel %vm317_vm1, %v379_v48, 0.0 }
  0x7e   : > { %v380_v51 = vsel %vm374_vm3, %v377_v47, 0.0  ;;  %v392_v52 = vcombine.high %v390_v49, %v390_v49  ;;  %v394_v53 = vsel %vm373_vm2, %v390_v49, %v362_v46 }
  0x7f   : > { %v382_v54 = vsel %vm317_vm1, %v380_v51, 0.0  ;;  %v396_v55 = vsel %vm317_vm1, %v394_v53, 0.0 }
  0x80   : > { %v383_v56 = vadd.f32 %v382_v54, %v381_v50  ;;  %v395_v57 = vsel %vm374_vm3, %v392_v52, %v377_v47 }
  0x81   : > { %v397_v58 = vsel %vm317_vm1, %v395_v57, 0.0 }
  0x82   : > { %384 = vadd.xlane.f32.xlu0 %v383_v56  ;;  %v398_v59 = vadd.f32 %v397_v58, %v396_v55 }
  0x86   : > { %399 = vadd.xlane.f32.xlu0 %v398_v59 }
 0x10b   : > { %v385_v61 = vpop.xlane.xlu0 %384 }
 0x10c   : > { %v386_v62 = vadd.f32 %v385_v61, %v375_v60 }
 0x10e   : > { %388 = vst.msk [vmem:[%s898_s22] sm:$0xf] %vm309_vm0, %v386_v62 }
 0x10f   : > { %v400_v1 = vpop.xlane.xlu0 %399 }
 0x110   : > { %v401_v2 = vadd.f32 %v400_v1, %v389_v63 }
 0x112   : > { %402 = vst.msk [vmem:[%s304_s27] sm:$0xf] %vm309_vm0, %v401_v2 }
 0x113 PF: > { %s20_s17 = sadd.s32 1, %s756_s17   ;;  %s949_s12 = smov %s740_s13 }
 0x114   : > { %p17_p7 = scmp.ge.s32.totalorder %s20_s17, 4   ;;  %s950_s13 = smov %s744_s14 }
 0x115   : > { %s951_s14 = smov %s830_s24  ;;  %s952_s15 = smov %s752_s16 }
 0x116   : > { %s953_s16 = smov %s955_s19  ;;  %19 = sbr.rel (!%p17_p7) target bundleno = 6 (0x6), region = 97 }
 0x11b   :  { %448 = vsyncpa [#allocation3], 1 }
 0x11c   :  { %450 = vsyncpa [#allocation3 + $0x1], 1 }
 0x11d   :  { %451 = vsyncpa [#allocation5], 1 }
 0x11e   :  { %453 = vsyncpa [#allocation5 + $0x1], 1 }

</bundles_post_ra>
